<compile_context>
chip_gen: v7x
topology: tpu7x:2x2x1
jax: 0.10.0
libtpu: 0.0.40
codegen_flags: <defaults>
</compile_context>

<pallas_src>
import jax
import jax.numpy as jnp
import numpy as np
from jax.experimental import pallas as pl
from jax.experimental.pallas import tpu as pltpu


def _conv_residual_relu_kernel(x_ref, w_ref, b_ref, o_ref):
    # x_ref: (BN, C, L)      VMEM block, NCL layout (C on sublanes, L on lanes)
    # w_ref: (C_out, K*C_in) VMEM; w_ref[o, k*C + i] == w_eff[o, i, k]
    #                        (residual identity folded into the center tap)
    # b_ref: (C_out, 1)      VMEM; conv2.bias as a sublane column
    # o_ref: (BN, C, L)      VMEM output block
    BN, C, L = x_ref.shape
    K = 3

    lane = jax.lax.broadcasted_iota(jnp.int32, (C, L), 1)

    # Hoist loop-invariant values out of the batch loop (JAX does not CSE
    # broadcast_in_dim, and the weight tile is tiny — keep it live in vregs).
    w = w_ref[...]                                                    # (C, K*C)
    w_cols = [[w[:, k * C + i: k * C + i + 1] for i in range(C)]      # (C_out, 1)
              for k in range(K)]
    bias_plane = jnp.broadcast_to(b_ref[...], (C, L))                 # (C, L)

    def body(n, carry):
        x = x_ref[n]                                                  # (C, L) full tiles
        # padding=1 halo: lane rotation on the XLU + one-lane boundary mask.
        x_prev = jnp.where(lane >= 1, pltpu.roll(x, shift=1, axis=1), 0.0)
        x_next = jnp.where(lane < L - 1, pltpu.roll(x, shift=L - 1, axis=1), 0.0)
        taps = (x_prev, x, x_next)   # taps[k][i, l] == x[i, l + k - 1] (zero padded)

        # out[o, l] = relu( b[o] + sum_{i,k} w_eff[o,i,k] * x[i, l+k-1] )
        acc = bias_plane                                              # residual is in w_eff
        for k in range(K):
            t = taps[k]
            for i in range(C):
                # (C_out,1) lane-broadcast column * (1,L) sublane-broadcast row
                # -> full (C_out, L) MAC on the VPU.
                acc = acc + w_cols[k][i] * t[i: i + 1, :]
        # Single whole-plane, unmasked lane-dense store.
        o_ref[n] = jnp.maximum(acc, 0.0).astype(o_ref.dtype)
        return carry

    jax.lax.fori_loop(0, BN, body, None, unroll=bool(BN <= 8))


def _pick_block_n(n_batch, per_item_bytes, vmem_budget_bytes):
    """Largest divisor of N whose block stays near ~2 MiB and inside budget."""
    target = 2 * 1024 * 1024
    cap = max(per_item_bytes, vmem_budget_bytes // 6)   # 2x in + 2x out buffers + slack
    limit_n = max(1, min(target, cap) // per_item_bytes)
    divisors = [d for d in range(1, n_batch + 1) if n_batch % d == 0]
    fits = [d for d in divisors if d <= limit_n]
    # TODO(synk): for large prime N (or very long L) pad the batch dim or add an
    # L-tiling grid axis with halo handling instead of degrading to block_n=1.
    return max(fits) if fits else 1


def base_conv1d_forward(x_ncl, w2_torch, b2):
    """x_ncl: (N, C, L) f32.  w2_torch: (C_out=C, C_in=C, 3).  b2: (C,)."""
    N, C, L = x_ncl.shape
    K = 3
    assert w2_torch.shape == (C, C, K) and b2.shape == (C,)
    # TODO(synk): generalize to C % 8 != 0 / L % 128 != 0 by padding to tile bounds.
    assert C % 8 == 0 and L % 128 == 0, "demo kernel expects sublane/lane-dense dims"

    # Fold the residual (y = conv2(x) + x) into the center tap: w_eff[o,o,1] += 1.
    w_eff = jnp.asarray(w2_torch).at[jnp.arange(C), jnp.arange(C), 1].add(1.0)
    # Kernel layout (C_out, K*C_in): a static lane column is w_eff[:, i, k].
    w_kernel = jnp.transpose(w_eff, (0, 2, 1)).reshape(C, K * C)
    b_kernel = jnp.asarray(b2).reshape(C, 1)

    itemsize = x_ncl.dtype.itemsize
    try:
        vmem_cap = int(pltpu.get_tpu_info().vmem_capacity_bytes)
    except Exception:
        vmem_cap = 64 * 1024 * 1024   # conservative: v7x per-TensorCore VMEM
    vmem_budget = vmem_cap // 2       # leave headroom for compiler scratch

    block_n = _pick_block_n(N, C * L * itemsize, vmem_budget)
    block_bytes = block_n * C * L * itemsize
    grid = (N // block_n,)
    vmem_limit = int(min(vmem_budget,
                         max(6 * block_bytes + (2 << 20), 32 * 1024 * 1024)))

    return pl.pallas_call(
        _conv_residual_relu_kernel,
        out_shape=jax.ShapeDtypeStruct((N, C, L), x_ncl.dtype),
        grid_spec=pltpu.PrefetchScalarGridSpec(
            num_scalar_prefetch=0,
            grid=grid,
            in_specs=[
                pl.BlockSpec((block_n, C, L), lambda n: (n, 0, 0)),
                pl.BlockSpec(memory_space=pltpu.MemorySpace.VMEM),  # weights (whole)
                pl.BlockSpec(memory_space=pltpu.MemorySpace.VMEM),  # bias (whole)
            ],
            out_specs=pl.BlockSpec((block_n, C, L), lambda n: (n, 0, 0)),
        ),
        compiler_params=pltpu.CompilerParams(
            dimension_semantics=("parallel",),
            vmem_limit_bytes=vmem_limit),
    )(x_ncl, w_kernel, b_kernel)


def _reference_forward(x_ncl, w2_torch, b2):
    """Pure-JAX reference: relu(conv2(x) + x) with padding=1 (NCL == NCW)."""
    y = jax.lax.conv_general_dilated(
        x_ncl, w2_torch, window_strides=(1,), padding=((1, 1),),
        dimension_numbers=("NCH", "OIH", "NCH"))
    y = y + b2[None, :, None]
    y = y + x_ncl
    return jnp.maximum(y, 0.0)


if __name__ == "__main__":
    # batch=2, input_dim=output_dim=8, seq len=128 (sublane/lane-dense layout)
    N, C, L = 2, 8, 128
    key = jax.random.PRNGKey(0)
    kx, kw1, kb1, kw2, kb2 = jax.random.split(key, 5)

    x = jax.random.normal(kx, (N, C, L), dtype=jnp.float32)

    # Deterministic parameter init (PyTorch Conv1d shapes):
    #   conv1.weight/bias are dead in the forward pass (result overwritten).
    bound = 1.0 / np.sqrt(C * 3)
    _w1 = jax.random.uniform(kw1, (C, C, 3), jnp.float32, -bound, bound)  # unused
    _b1 = jax.random.uniform(kb1, (C,), jnp.float32, -bound, bound)       # unused
    w2 = jax.random.uniform(kw2, (C, C, 3), jnp.float32, -bound, bound)
    b2 = jax.random.uniform(kb2, (C,), jnp.float32, -bound, bound)

    out = jax.block_until_ready(base_conv1d_forward(x, w2, b2))
    ref = jax.block_until_ready(_reference_forward(x, w2, b2))

    assert out.shape == (N, C, L)
    np.testing.assert_allclose(np.asarray(out), np.asarray(ref),
                               rtol=1e-5, atol=1e-5)
    print("KERNEL_OK")
</pallas_src>

<mosaic_0001>
module attributes {stable_mosaic.version = 11 : i64} {
  func.func @_conv_residual_relu_kernel(%arg0: i32, %arg1: memref<2x8x128xf32, #tpu.memory_space<vmem>>, %arg2: memref<8x24xf32, #tpu.memory_space<vmem>>, %arg3: memref<8x1xf32, #tpu.memory_space<vmem>>, %arg4: memref<2x8x128xf32, #tpu.memory_space<vmem>>) attributes {dimension_semantics = [#tpu.dimension_semantics<parallel>], iteration_bounds = array<i64: 1>, scalar_prefetch = 0 : i64, scratch_operands = 0 : i64, tpu.core_type = #tpu.core_type<tc>, window_params = [{transform_indices = @transform_0, window_bounds = array<i64: 2, 8, 128>}, {pipeline_mode = #tpu.pipeline_mode<synchronous>, transform_indices = @transform_1, window_bounds = array<i64: 8, 24>}, {pipeline_mode = #tpu.pipeline_mode<synchronous>, transform_indices = @transform_2, window_bounds = array<i64: 8, 1>}, {transform_indices = @transform_3, window_bounds = array<i64: 2, 8, 128>}]} {
    %0 = tpu.iota {dimensions = array<i32: 1>} : vector<8x128xi32>
    %c0 = arith.constant 0 : index
    %c0_0 = arith.constant 0 : index
    %1 = vector.load %arg2[%c0, %c0_0] : memref<8x24xf32, #tpu.memory_space<vmem>>, vector<8x24xf32>
    %2 = vector.extract_strided_slice %1 {offsets = [0, 0], sizes = [8, 1], strides = [1, 1]} : vector<8x24xf32> to vector<8x1xf32>
    %3 = vector.extract_strided_slice %1 {offsets = [0, 1], sizes = [8, 1], strides = [1, 1]} : vector<8x24xf32> to vector<8x1xf32>
    %4 = vector.extract_strided_slice %1 {offsets = [0, 2], sizes = [8, 1], strides = [1, 1]} : vector<8x24xf32> to vector<8x1xf32>
    %5 = vector.extract_strided_slice %1 {offsets = [0, 3], sizes = [8, 1], strides = [1, 1]} : vector<8x24xf32> to vector<8x1xf32>
    %6 = vector.extract_strided_slice %1 {offsets = [0, 4], sizes = [8, 1], strides = [1, 1]} : vector<8x24xf32> to vector<8x1xf32>
    %7 = vector.extract_strided_slice %1 {offsets = [0, 5], sizes = [8, 1], strides = [1, 1]} : vector<8x24xf32> to vector<8x1xf32>
    %8 = vector.extract_strided_slice %1 {offsets = [0, 6], sizes = [8, 1], strides = [1, 1]} : vector<8x24xf32> to vector<8x1xf32>
    %9 = vector.extract_strided_slice %1 {offsets = [0, 7], sizes = [8, 1], strides = [1, 1]} : vector<8x24xf32> to vector<8x1xf32>
    %10 = vector.extract_strided_slice %1 {offsets = [0, 8], sizes = [8, 1], strides = [1, 1]} : vector<8x24xf32> to vector<8x1xf32>
    %11 = vector.extract_strided_slice %1 {offsets = [0, 9], sizes = [8, 1], strides = [1, 1]} : vector<8x24xf32> to vector<8x1xf32>
    %12 = vector.extract_strided_slice %1 {offsets = [0, 10], sizes = [8, 1], strides = [1, 1]} : vector<8x24xf32> to vector<8x1xf32>
    %13 = vector.extract_strided_slice %1 {offsets = [0, 11], sizes = [8, 1], strides = [1, 1]} : vector<8x24xf32> to vector<8x1xf32>
    %14 = vector.extract_strided_slice %1 {offsets = [0, 12], sizes = [8, 1], strides = [1, 1]} : vector<8x24xf32> to vector<8x1xf32>
    %15 = vector.extract_strided_slice %1 {offsets = [0, 13], sizes = [8, 1], strides = [1, 1]} : vector<8x24xf32> to vector<8x1xf32>
    %16 = vector.extract_strided_slice %1 {offsets = [0, 14], sizes = [8, 1], strides = [1, 1]} : vector<8x24xf32> to vector<8x1xf32>
    %17 = vector.extract_strided_slice %1 {offsets = [0, 15], sizes = [8, 1], strides = [1, 1]} : vector<8x24xf32> to vector<8x1xf32>
    %18 = vector.extract_strided_slice %1 {offsets = [0, 16], sizes = [8, 1], strides = [1, 1]} : vector<8x24xf32> to vector<8x1xf32>
    %19 = vector.extract_strided_slice %1 {offsets = [0, 17], sizes = [8, 1], strides = [1, 1]} : vector<8x24xf32> to vector<8x1xf32>
    %20 = vector.extract_strided_slice %1 {offsets = [0, 18], sizes = [8, 1], strides = [1, 1]} : vector<8x24xf32> to vector<8x1xf32>
    %21 = vector.extract_strided_slice %1 {offsets = [0, 19], sizes = [8, 1], strides = [1, 1]} : vector<8x24xf32> to vector<8x1xf32>
    %22 = vector.extract_strided_slice %1 {offsets = [0, 20], sizes = [8, 1], strides = [1, 1]} : vector<8x24xf32> to vector<8x1xf32>
    %23 = vector.extract_strided_slice %1 {offsets = [0, 21], sizes = [8, 1], strides = [1, 1]} : vector<8x24xf32> to vector<8x1xf32>
    %24 = vector.extract_strided_slice %1 {offsets = [0, 22], sizes = [8, 1], strides = [1, 1]} : vector<8x24xf32> to vector<8x1xf32>
    %25 = vector.extract_strided_slice %1 {offsets = [0, 23], sizes = [8, 1], strides = [1, 1]} : vector<8x24xf32> to vector<8x1xf32>
    %c0_1 = arith.constant 0 : index
    %c0_2 = arith.constant 0 : index
    %26 = vector.load %arg3[%c0_1, %c0_2] : memref<8x1xf32, #tpu.memory_space<vmem>>, vector<8x1xf32>
    %27 = vector.shape_cast %26 : vector<8x1xf32> to vector<8x1xf32>
    %28 = vector.broadcast %27 : vector<8x1xf32> to vector<8x128xf32>
    %c0_i32 = arith.constant 0 : i32
    %29 = arith.index_cast %c0_i32 : i32 to index
    %c0_3 = arith.constant 0 : index
    %c0_4 = arith.constant 0 : index
    %30 = vector.load %arg1[%29, %c0_3, %c0_4] : memref<2x8x128xf32, #tpu.memory_space<vmem>>, vector<1x8x128xf32>
    %31 = vector.shape_cast %30 : vector<1x8x128xf32> to vector<8x128xf32>
    %c1_i32 = arith.constant 1 : i32
    %32 = vector.broadcast %c1_i32 : i32 to vector<8x128xi32>
    %33 = arith.cmpi sge, %0, %32 : vector<8x128xi32>
    %c1_i32_5 = arith.constant 1 : i32
    %34 = tpu.dynamic_rotate %31 by %c1_i32_5 dim 1 : vector<8x128xf32>, i32 -> vector<8x128xf32>
    %cst = arith.constant 0.000000e+00 : f32
    %35 = vector.broadcast %cst : f32 to vector<8x128xf32>
    %36 = arith.select %33, %34, %35 : vector<8x128xi1>, vector<8x128xf32>
    %c127_i32 = arith.constant 127 : i32
    %37 = vector.broadcast %c127_i32 : i32 to vector<8x128xi32>
    %38 = arith.cmpi slt, %0, %37 : vector<8x128xi32>
    %c127_i32_6 = arith.constant 127 : i32
    %39 = tpu.dynamic_rotate %31 by %c127_i32_6 dim 1 : vector<8x128xf32>, i32 -> vector<8x128xf32>
    %cst_7 = arith.constant 0.000000e+00 : f32
    %40 = vector.broadcast %cst_7 : f32 to vector<8x128xf32>
    %41 = arith.select %38, %39, %40 : vector<8x128xi1>, vector<8x128xf32>
    %42 = vector.extract_strided_slice %36 {offsets = [0, 0], sizes = [1, 128], strides = [1, 1]} : vector<8x128xf32> to vector<1x128xf32>
    %43 = vector.broadcast %2 : vector<8x1xf32> to vector<8x128xf32>
    %44 = vector.broadcast %42 : vector<1x128xf32> to vector<8x128xf32>
    %45 = arith.mulf %43, %44 : vector<8x128xf32>
    %46 = arith.addf %28, %45 : vector<8x128xf32>
    %47 = vector.extract_strided_slice %36 {offsets = [1, 0], sizes = [1, 128], strides = [1, 1]} : vector<8x128xf32> to vector<1x128xf32>
    %48 = vector.broadcast %3 : vector<8x1xf32> to vector<8x128xf32>
    %49 = vector.broadcast %47 : vector<1x128xf32> to vector<8x128xf32>
    %50 = arith.mulf %48, %49 : vector<8x128xf32>
    %51 = arith.addf %46, %50 : vector<8x128xf32>
    %52 = vector.extract_strided_slice %36 {offsets = [2, 0], sizes = [1, 128], strides = [1, 1]} : vector<8x128xf32> to vector<1x128xf32>
    %53 = vector.broadcast %4 : vector<8x1xf32> to vector<8x128xf32>
    %54 = vector.broadcast %52 : vector<1x128xf32> to vector<8x128xf32>
    %55 = arith.mulf %53, %54 : vector<8x128xf32>
    %56 = arith.addf %51, %55 : vector<8x128xf32>
    %57 = vector.extract_strided_slice %36 {offsets = [3, 0], sizes = [1, 128], strides = [1, 1]} : vector<8x128xf32> to vector<1x128xf32>
    %58 = vector.broadcast %5 : vector<8x1xf32> to vector<8x128xf32>
    %59 = vector.broadcast %57 : vector<1x128xf32> to vector<8x128xf32>
    %60 = arith.mulf %58, %59 : vector<8x128xf32>
    %61 = arith.addf %56, %60 : vector<8x128xf32>
    %62 = vector.extract_strided_slice %36 {offsets = [4, 0], sizes = [1, 128], strides = [1, 1]} : vector<8x128xf32> to vector<1x128xf32>
    %63 = vector.broadcast %6 : vector<8x1xf32> to vector<8x128xf32>
    %64 = vector.broadcast %62 : vector<1x128xf32> to vector<8x128xf32>
    %65 = arith.mulf %63, %64 : vector<8x128xf32>
    %66 = arith.addf %61, %65 : vector<8x128xf32>
    %67 = vector.extract_strided_slice %36 {offsets = [5, 0], sizes = [1, 128], strides = [1, 1]} : vector<8x128xf32> to vector<1x128xf32>
    %68 = vector.broadcast %7 : vector<8x1xf32> to vector<8x128xf32>
    %69 = vector.broadcast %67 : vector<1x128xf32> to vector<8x128xf32>
    %70 = arith.mulf %68, %69 : vector<8x128xf32>
    %71 = arith.addf %66, %70 : vector<8x128xf32>
    %72 = vector.extract_strided_slice %36 {offsets = [6, 0], sizes = [1, 128], strides = [1, 1]} : vector<8x128xf32> to vector<1x128xf32>
    %73 = vector.broadcast %8 : vector<8x1xf32> to vector<8x128xf32>
    %74 = vector.broadcast %72 : vector<1x128xf32> to vector<8x128xf32>
    %75 = arith.mulf %73, %74 : vector<8x128xf32>
    %76 = arith.addf %71, %75 : vector<8x128xf32>
    %77 = vector.extract_strided_slice %36 {offsets = [7, 0], sizes = [1, 128], strides = [1, 1]} : vector<8x128xf32> to vector<1x128xf32>
    %78 = vector.broadcast %9 : vector<8x1xf32> to vector<8x128xf32>
    %79 = vector.broadcast %77 : vector<1x128xf32> to vector<8x128xf32>
    %80 = arith.mulf %78, %79 : vector<8x128xf32>
    %81 = arith.addf %76, %80 : vector<8x128xf32>
    %82 = vector.extract_strided_slice %31 {offsets = [0, 0], sizes = [1, 128], strides = [1, 1]} : vector<8x128xf32> to vector<1x128xf32>
    %83 = vector.broadcast %10 : vector<8x1xf32> to vector<8x128xf32>
    %84 = vector.broadcast %82 : vector<1x128xf32> to vector<8x128xf32>
    %85 = arith.mulf %83, %84 : vector<8x128xf32>
    %86 = arith.addf %81, %85 : vector<8x128xf32>
    %87 = vector.extract_strided_slice %31 {offsets = [1, 0], sizes = [1, 128], strides = [1, 1]} : vector<8x128xf32> to vector<1x128xf32>
    %88 = vector.broadcast %11 : vector<8x1xf32> to vector<8x128xf32>
    %89 = vector.broadcast %87 : vector<1x128xf32> to vector<8x128xf32>
    %90 = arith.mulf %88, %89 : vector<8x128xf32>
    %91 = arith.addf %86, %90 : vector<8x128xf32>
    %92 = vector.extract_strided_slice %31 {offsets = [2, 0], sizes = [1, 128], strides = [1, 1]} : vector<8x128xf32> to vector<1x128xf32>
    %93 = vector.broadcast %12 : vector<8x1xf32> to vector<8x128xf32>
    %94 = vector.broadcast %92 : vector<1x128xf32> to vector<8x128xf32>
    %95 = arith.mulf %93, %94 : vector<8x128xf32>
    %96 = arith.addf %91, %95 : vector<8x128xf32>
    %97 = vector.extract_strided_slice %31 {offsets = [3, 0], sizes = [1, 128], strides = [1, 1]} : vector<8x128xf32> to vector<1x128xf32>
    %98 = vector.broadcast %13 : vector<8x1xf32> to vector<8x128xf32>
    %99 = vector.broadcast %97 : vector<1x128xf32> to vector<8x128xf32>
    %100 = arith.mulf %98, %99 : vector<8x128xf32>
    %101 = arith.addf %96, %100 : vector<8x128xf32>
    %102 = vector.extract_strided_slice %31 {offsets = [4, 0], sizes = [1, 128], strides = [1, 1]} : vector<8x128xf32> to vector<1x128xf32>
    %103 = vector.broadcast %14 : vector<8x1xf32> to vector<8x128xf32>
    %104 = vector.broadcast %102 : vector<1x128xf32> to vector<8x128xf32>
    %105 = arith.mulf %103, %104 : vector<8x128xf32>
    %106 = arith.addf %101, %105 : vector<8x128xf32>
    %107 = vector.extract_strided_slice %31 {offsets = [5, 0], sizes = [1, 128], strides = [1, 1]} : vector<8x128xf32> to vector<1x128xf32>
    %108 = vector.broadcast %15 : vector<8x1xf32> to vector<8x128xf32>
    %109 = vector.broadcast %107 : vector<1x128xf32> to vector<8x128xf32>
    %110 = arith.mulf %108, %109 : vector<8x128xf32>
    %111 = arith.addf %106, %110 : vector<8x128xf32>
    %112 = vector.extract_strided_slice %31 {offsets = [6, 0], sizes = [1, 128], strides = [1, 1]} : vector<8x128xf32> to vector<1x128xf32>
    %113 = vector.broadcast %16 : vector<8x1xf32> to vector<8x128xf32>
    %114 = vector.broadcast %112 : vector<1x128xf32> to vector<8x128xf32>
    %115 = arith.mulf %113, %114 : vector<8x128xf32>
    %116 = arith.addf %111, %115 : vector<8x128xf32>
    %117 = vector.extract_strided_slice %31 {offsets = [7, 0], sizes = [1, 128], strides = [1, 1]} : vector<8x128xf32> to vector<1x128xf32>
    %118 = vector.broadcast %17 : vector<8x1xf32> to vector<8x128xf32>
    %119 = vector.broadcast %117 : vector<1x128xf32> to vector<8x128xf32>
    %120 = arith.mulf %118, %119 : vector<8x128xf32>
    %121 = arith.addf %116, %120 : vector<8x128xf32>
    %122 = vector.extract_strided_slice %41 {offsets = [0, 0], sizes = [1, 128], strides = [1, 1]} : vector<8x128xf32> to vector<1x128xf32>
    %123 = vector.broadcast %18 : vector<8x1xf32> to vector<8x128xf32>
    %124 = vector.broadcast %122 : vector<1x128xf32> to vector<8x128xf32>
    %125 = arith.mulf %123, %124 : vector<8x128xf32>
    %126 = arith.addf %121, %125 : vector<8x128xf32>
    %127 = vector.extract_strided_slice %41 {offsets = [1, 0], sizes = [1, 128], strides = [1, 1]} : vector<8x128xf32> to vector<1x128xf32>
    %128 = vector.broadcast %19 : vector<8x1xf32> to vector<8x128xf32>
    %129 = vector.broadcast %127 : vector<1x128xf32> to vector<8x128xf32>
    %130 = arith.mulf %128, %129 : vector<8x128xf32>
    %131 = arith.addf %126, %130 : vector<8x128xf32>
    %132 = vector.extract_strided_slice %41 {offsets = [2, 0], sizes = [1, 128], strides = [1, 1]} : vector<8x128xf32> to vector<1x128xf32>
    %133 = vector.broadcast %20 : vector<8x1xf32> to vector<8x128xf32>
    %134 = vector.broadcast %132 : vector<1x128xf32> to vector<8x128xf32>
    %135 = arith.mulf %133, %134 : vector<8x128xf32>
    %136 = arith.addf %131, %135 : vector<8x128xf32>
    %137 = vector.extract_strided_slice %41 {offsets = [3, 0], sizes = [1, 128], strides = [1, 1]} : vector<8x128xf32> to vector<1x128xf32>
    %138 = vector.broadcast %21 : vector<8x1xf32> to vector<8x128xf32>
    %139 = vector.broadcast %137 : vector<1x128xf32> to vector<8x128xf32>
    %140 = arith.mulf %138, %139 : vector<8x128xf32>
    %141 = arith.addf %136, %140 : vector<8x128xf32>
    %142 = vector.extract_strided_slice %41 {offsets = [4, 0], sizes = [1, 128], strides = [1, 1]} : vector<8x128xf32> to vector<1x128xf32>
    %143 = vector.broadcast %22 : vector<8x1xf32> to vector<8x128xf32>
    %144 = vector.broadcast %142 : vector<1x128xf32> to vector<8x128xf32>
    %145 = arith.mulf %143, %144 : vector<8x128xf32>
    %146 = arith.addf %141, %145 : vector<8x128xf32>
    %147 = vector.extract_strided_slice %41 {offsets = [5, 0], sizes = [1, 128], strides = [1, 1]} : vector<8x128xf32> to vector<1x128xf32>
    %148 = vector.broadcast %23 : vector<8x1xf32> to vector<8x128xf32>
    %149 = vector.broadcast %147 : vector<1x128xf32> to vector<8x128xf32>
    %150 = arith.mulf %148, %149 : vector<8x128xf32>
    %151 = arith.addf %146, %150 : vector<8x128xf32>
    %152 = vector.extract_strided_slice %41 {offsets = [6, 0], sizes = [1, 128], strides = [1, 1]} : vector<8x128xf32> to vector<1x128xf32>
    %153 = vector.broadcast %24 : vector<8x1xf32> to vector<8x128xf32>
    %154 = vector.broadcast %152 : vector<1x128xf32> to vector<8x128xf32>
    %155 = arith.mulf %153, %154 : vector<8x128xf32>
    %156 = arith.addf %151, %155 : vector<8x128xf32>
    %157 = vector.extract_strided_slice %41 {offsets = [7, 0], sizes = [1, 128], strides = [1, 1]} : vector<8x128xf32> to vector<1x128xf32>
    %158 = vector.broadcast %25 : vector<8x1xf32> to vector<8x128xf32>
    %159 = vector.broadcast %157 : vector<1x128xf32> to vector<8x128xf32>
    %160 = arith.mulf %158, %159 : vector<8x128xf32>
    %161 = arith.addf %156, %160 : vector<8x128xf32>
    %cst_8 = arith.constant 0.000000e+00 : f32
    %162 = vector.broadcast %cst_8 : f32 to vector<8x128xf32>
    %163 = arith.maximumf %161, %162 : vector<8x128xf32>
    %164 = arith.index_cast %c0_i32 : i32 to index
    %c0_9 = arith.constant 0 : index
    %c0_10 = arith.constant 0 : index
    %165 = vector.load %arg4[%164, %c0_9, %c0_10] : memref<2x8x128xf32, #tpu.memory_space<vmem>>, vector<1x8x128xf32>
    %166 = vector.shape_cast %165 : vector<1x8x128xf32> to vector<8x128xf32>
    %167 = vector.shape_cast %163 : vector<8x128xf32> to vector<1x8x128xf32>
    tpu.vector_store %arg4[%164, %c0_9, %c0_10], %167 {strides = array<i32>} : memref<2x8x128xf32, #tpu.memory_space<vmem>>, vector<1x8x128xf32>,
    %c1_i32_11 = arith.constant 1 : i32
    %168 = arith.index_cast %c1_i32_11 : i32 to index
    %c0_12 = arith.constant 0 : index
    %c0_13 = arith.constant 0 : index
    %169 = vector.load %arg1[%168, %c0_12, %c0_13] : memref<2x8x128xf32, #tpu.memory_space<vmem>>, vector<1x8x128xf32>
    %170 = vector.shape_cast %169 : vector<1x8x128xf32> to vector<8x128xf32>
    %c1_i32_14 = arith.constant 1 : i32
    %171 = vector.broadcast %c1_i32_14 : i32 to vector<8x128xi32>
    %172 = arith.cmpi sge, %0, %171 : vector<8x128xi32>
    %c1_i32_15 = arith.constant 1 : i32
    %173 = tpu.dynamic_rotate %170 by %c1_i32_15 dim 1 : vector<8x128xf32>, i32 -> vector<8x128xf32>
    %cst_16 = arith.constant 0.000000e+00 : f32
    %174 = vector.broadcast %cst_16 : f32 to vector<8x128xf32>
    %175 = arith.select %172, %173, %174 : vector<8x128xi1>, vector<8x128xf32>
    %c127_i32_17 = arith.constant 127 : i32
    %176 = vector.broadcast %c127_i32_17 : i32 to vector<8x128xi32>
    %177 = arith.cmpi slt, %0, %176 : vector<8x128xi32>
    %c127_i32_18 = arith.constant 127 : i32
    %178 = tpu.dynamic_rotate %170 by %c127_i32_18 dim 1 : vector<8x128xf32>, i32 -> vector<8x128xf32>
    %cst_19 = arith.constant 0.000000e+00 : f32
    %179 = vector.broadcast %cst_19 : f32 to vector<8x128xf32>
    %180 = arith.select %177, %178, %179 : vector<8x128xi1>, vector<8x128xf32>
    %181 = vector.extract_strided_slice %175 {offsets = [0, 0], sizes = [1, 128], strides = [1, 1]} : vector<8x128xf32> to vector<1x128xf32>
    %182 = vector.broadcast %2 : vector<8x1xf32> to vector<8x128xf32>
    %183 = vector.broadcast %181 : vector<1x128xf32> to vector<8x128xf32>
    %184 = arith.mulf %182, %183 : vector<8x128xf32>
    %185 = arith.addf %28, %184 : vector<8x128xf32>
    %186 = vector.extract_strided_slice %175 {offsets = [1, 0], sizes = [1, 128], strides = [1, 1]} : vector<8x128xf32> to vector<1x128xf32>
    %187 = vector.broadcast %3 : vector<8x1xf32> to vector<8x128xf32>
    %188 = vector.broadcast %186 : vector<1x128xf32> to vector<8x128xf32>
    %189 = arith.mulf %187, %188 : vector<8x128xf32>
    %190 = arith.addf %185, %189 : vector<8x128xf32>
    %191 = vector.extract_strided_slice %175 {offsets = [2, 0], sizes = [1, 128], strides = [1, 1]} : vector<8x128xf32> to vector<1x128xf32>
    %192 = vector.broadcast %4 : vector<8x1xf32> to vector<8x128xf32>
    %193 = vector.broadcast %191 : vector<1x128xf32> to vector<8x128xf32>
    %194 = arith.mulf %192, %193 : vector<8x128xf32>
    %195 = arith.addf %190, %194 : vector<8x128xf32>
    %196 = vector.extract_strided_slice %175 {offsets = [3, 0], sizes = [1, 128], strides = [1, 1]} : vector<8x128xf32> to vector<1x128xf32>
    %197 = vector.broadcast %5 : vector<8x1xf32> to vector<8x128xf32>
    %198 = vector.broadcast %196 : vector<1x128xf32> to vector<8x128xf32>
    %199 = arith.mulf %197, %198 : vector<8x128xf32>
    %200 = arith.addf %195, %199 : vector<8x128xf32>
    %201 = vector.extract_strided_slice %175 {offsets = [4, 0], sizes = [1, 128], strides = [1, 1]} : vector<8x128xf32> to vector<1x128xf32>
    %202 = vector.broadcast %6 : vector<8x1xf32> to vector<8x128xf32>
    %203 = vector.broadcast %201 : vector<1x128xf32> to vector<8x128xf32>
    %204 = arith.mulf %202, %203 : vector<8x128xf32>
    %205 = arith.addf %200, %204 : vector<8x128xf32>
    %206 = vector.extract_strided_slice %175 {offsets = [5, 0], sizes = [1, 128], strides = [1, 1]} : vector<8x128xf32> to vector<1x128xf32>
    %207 = vector.broadcast %7 : vector<8x1xf32> to vector<8x128xf32>
    %208 = vector.broadcast %206 : vector<1x128xf32> to vector<8x128xf32>
    %209 = arith.mulf %207, %208 : vector<8x128xf32>
    %210 = arith.addf %205, %209 : vector<8x128xf32>
    %211 = vector.extract_strided_slice %175 {offsets = [6, 0], sizes = [1, 128], strides = [1, 1]} : vector<8x128xf32> to vector<1x128xf32>
    %212 = vector.broadcast %8 : vector<8x1xf32> to vector<8x128xf32>
    %213 = vector.broadcast %211 : vector<1x128xf32> to vector<8x128xf32>
    %214 = arith.mulf %212, %213 : vector<8x128xf32>
    %215 = arith.addf %210, %214 : vector<8x128xf32>
    %216 = vector.extract_strided_slice %175 {offsets = [7, 0], sizes = [1, 128], strides = [1, 1]} : vector<8x128xf32> to vector<1x128xf32>
    %217 = vector.broadcast %9 : vector<8x1xf32> to vector<8x128xf32>
    %218 = vector.broadcast %216 : vector<1x128xf32> to vector<8x128xf32>
    %219 = arith.mulf %217, %218 : vector<8x128xf32>
    %220 = arith.addf %215, %219 : vector<8x128xf32>
    %221 = vector.extract_strided_slice %170 {offsets = [0, 0], sizes = [1, 128], strides = [1, 1]} : vector<8x128xf32> to vector<1x128xf32>
    %222 = vector.broadcast %10 : vector<8x1xf32> to vector<8x128xf32>
    %223 = vector.broadcast %221 : vector<1x128xf32> to vector<8x128xf32>
    %224 = arith.mulf %222, %223 : vector<8x128xf32>
    %225 = arith.addf %220, %224 : vector<8x128xf32>
    %226 = vector.extract_strided_slice %170 {offsets = [1, 0], sizes = [1, 128], strides = [1, 1]} : vector<8x128xf32> to vector<1x128xf32>
    %227 = vector.broadcast %11 : vector<8x1xf32> to vector<8x128xf32>
    %228 = vector.broadcast %226 : vector<1x128xf32> to vector<8x128xf32>
    %229 = arith.mulf %227, %228 : vector<8x128xf32>
    %230 = arith.addf %225, %229 : vector<8x128xf32>
    %231 = vector.extract_strided_slice %170 {offsets = [2, 0], sizes = [1, 128], strides = [1, 1]} : vector<8x128xf32> to vector<1x128xf32>
    %232 = vector.broadcast %12 : vector<8x1xf32> to vector<8x128xf32>
    %233 = vector.broadcast %231 : vector<1x128xf32> to vector<8x128xf32>
    %234 = arith.mulf %232, %233 : vector<8x128xf32>
    %235 = arith.addf %230, %234 : vector<8x128xf32>
    %236 = vector.extract_strided_slice %170 {offsets = [3, 0], sizes = [1, 128], strides = [1, 1]} : vector<8x128xf32> to vector<1x128xf32>
    %237 = vector.broadcast %13 : vector<8x1xf32> to vector<8x128xf32>
    %238 = vector.broadcast %236 : vector<1x128xf32> to vector<8x128xf32>
    %239 = arith.mulf %237, %238 : vector<8x128xf32>
    %240 = arith.addf %235, %239 : vector<8x128xf32>
    %241 = vector.extract_strided_slice %170 {offsets = [4, 0], sizes = [1, 128], strides = [1, 1]} : vector<8x128xf32> to vector<1x128xf32>
    %242 = vector.broadcast %14 : vector<8x1xf32> to vector<8x128xf32>
    %243 = vector.broadcast %241 : vector<1x128xf32> to vector<8x128xf32>
    %244 = arith.mulf %242, %243 : vector<8x128xf32>
    %245 = arith.addf %240, %244 : vector<8x128xf32>
    %246 = vector.extract_strided_slice %170 {offsets = [5, 0], sizes = [1, 128], strides = [1, 1]} : vector<8x128xf32> to vector<1x128xf32>
    %247 = vector.broadcast %15 : vector<8x1xf32> to vector<8x128xf32>
    %248 = vector.broadcast %246 : vector<1x128xf32> to vector<8x128xf32>
    %249 = arith.mulf %247, %248 : vector<8x128xf32>
    %250 = arith.addf %245, %249 : vector<8x128xf32>
    %251 = vector.extract_strided_slice %170 {offsets = [6, 0], sizes = [1, 128], strides = [1, 1]} : vector<8x128xf32> to vector<1x128xf32>
    %252 = vector.broadcast %16 : vector<8x1xf32> to vector<8x128xf32>
    %253 = vector.broadcast %251 : vector<1x128xf32> to vector<8x128xf32>
    %254 = arith.mulf %252, %253 : vector<8x128xf32>
    %255 = arith.addf %250, %254 : vector<8x128xf32>
    %256 = vector.extract_strided_slice %170 {offsets = [7, 0], sizes = [1, 128], strides = [1, 1]} : vector<8x128xf32> to vector<1x128xf32>
    %257 = vector.broadcast %17 : vector<8x1xf32> to vector<8x128xf32>
    %258 = vector.broadcast %256 : vector<1x128xf32> to vector<8x128xf32>
    %259 = arith.mulf %257, %258 : vector<8x128xf32>
    %260 = arith.addf %255, %259 : vector<8x128xf32>
    %261 = vector.extract_strided_slice %180 {offsets = [0, 0], sizes = [1, 128], strides = [1, 1]} : vector<8x128xf32> to vector<1x128xf32>
    %262 = vector.broadcast %18 : vector<8x1xf32> to vector<8x128xf32>
    %263 = vector.broadcast %261 : vector<1x128xf32> to vector<8x128xf32>
    %264 = arith.mulf %262, %263 : vector<8x128xf32>
    %265 = arith.addf %260, %264 : vector<8x128xf32>
    %266 = vector.extract_strided_slice %180 {offsets = [1, 0], sizes = [1, 128], strides = [1, 1]} : vector<8x128xf32> to vector<1x128xf32>
    %267 = vector.broadcast %19 : vector<8x1xf32> to vector<8x128xf32>
    %268 = vector.broadcast %266 : vector<1x128xf32> to vector<8x128xf32>
    %269 = arith.mulf %267, %268 : vector<8x128xf32>
    %270 = arith.addf %265, %269 : vector<8x128xf32>
    %271 = vector.extract_strided_slice %180 {offsets = [2, 0], sizes = [1, 128], strides = [1, 1]} : vector<8x128xf32> to vector<1x128xf32>
    %272 = vector.broadcast %20 : vector<8x1xf32> to vector<8x128xf32>
    %273 = vector.broadcast %271 : vector<1x128xf32> to vector<8x128xf32>
    %274 = arith.mulf %272, %273 : vector<8x128xf32>
    %275 = arith.addf %270, %274 : vector<8x128xf32>
    %276 = vector.extract_strided_slice %180 {offsets = [3, 0], sizes = [1, 128], strides = [1, 1]} : vector<8x128xf32> to vector<1x128xf32>
    %277 = vector.broadcast %21 : vector<8x1xf32> to vector<8x128xf32>
    %278 = vector.broadcast %276 : vector<1x128xf32> to vector<8x128xf32>
    %279 = arith.mulf %277, %278 : vector<8x128xf32>
    %280 = arith.addf %275, %279 : vector<8x128xf32>
    %281 = vector.extract_strided_slice %180 {offsets = [4, 0], sizes = [1, 128], strides = [1, 1]} : vector<8x128xf32> to vector<1x128xf32>
    %282 = vector.broadcast %22 : vector<8x1xf32> to vector<8x128xf32>
    %283 = vector.broadcast %281 : vector<1x128xf32> to vector<8x128xf32>
    %284 = arith.mulf %282, %283 : vector<8x128xf32>
    %285 = arith.addf %280, %284 : vector<8x128xf32>
    %286 = vector.extract_strided_slice %180 {offsets = [5, 0], sizes = [1, 128], strides = [1, 1]} : vector<8x128xf32> to vector<1x128xf32>
    %287 = vector.broadcast %23 : vector<8x1xf32> to vector<8x128xf32>
    %288 = vector.broadcast %286 : vector<1x128xf32> to vector<8x128xf32>
    %289 = arith.mulf %287, %288 : vector<8x128xf32>
    %290 = arith.addf %285, %289 : vector<8x128xf32>
    %291 = vector.extract_strided_slice %180 {offsets = [6, 0], sizes = [1, 128], strides = [1, 1]} : vector<8x128xf32> to vector<1x128xf32>
    %292 = vector.broadcast %24 : vector<8x1xf32> to vector<8x128xf32>
    %293 = vector.broadcast %291 : vector<1x128xf32> to vector<8x128xf32>
    %294 = arith.mulf %292, %293 : vector<8x128xf32>
    %295 = arith.addf %290, %294 : vector<8x128xf32>
    %296 = vector.extract_strided_slice %180 {offsets = [7, 0], sizes = [1, 128], strides = [1, 1]} : vector<8x128xf32> to vector<1x128xf32>
    %297 = vector.broadcast %25 : vector<8x1xf32> to vector<8x128xf32>
    %298 = vector.broadcast %296 : vector<1x128xf32> to vector<8x128xf32>
    %299 = arith.mulf %297, %298 : vector<8x128xf32>
    %300 = arith.addf %295, %299 : vector<8x128xf32>
    %cst_20 = arith.constant 0.000000e+00 : f32
    %301 = vector.broadcast %cst_20 : f32 to vector<8x128xf32>
    %302 = arith.maximumf %300, %301 : vector<8x128xf32>
    %303 = arith.index_cast %c1_i32_11 : i32 to index
    %c0_21 = arith.constant 0 : index
    %c0_22 = arith.constant 0 : index
    %304 = vector.load %arg4[%303, %c0_21, %c0_22] : memref<2x8x128xf32, #tpu.memory_space<vmem>>, vector<1x8x128xf32>
    %305 = vector.shape_cast %304 : vector<1x8x128xf32> to vector<8x128xf32>
    %306 = vector.shape_cast %302 : vector<8x128xf32> to vector<1x8x128xf32>
    tpu.vector_store %arg4[%303, %c0_21, %c0_22], %306 {strides = array<i32>} : memref<2x8x128xf32, #tpu.memory_space<vmem>>, vector<1x8x128xf32>,
    %c2_i32 = arith.constant 2 : i32
    return
  }
  func.func @transform_0(%arg0: i32) -> (i32, i32, i32) {
    %c0_i32 = arith.constant 0 : i32
    %c0_i32_0 = arith.constant 0 : i32
    %c0_i32_1 = arith.constant 0 : i32
    return %arg0, %c0_i32, %c0_i32_0 : i32, i32, i32
  }
  func.func @transform_1(%arg0: i32) -> (i32, i32) {
    %c0_i32 = arith.constant 0 : i32
    %c0_i32_0 = arith.constant 0 : i32
    %c0_i32_1 = arith.constant 0 : i32
    return %c0_i32, %c0_i32_0 : i32, i32
  }
  func.func @transform_2(%arg0: i32) -> (i32, i32) {
    %c0_i32 = arith.constant 0 : i32
    %c0_i32_0 = arith.constant 0 : i32
    %c0_i32_1 = arith.constant 0 : i32
    return %c0_i32, %c0_i32_0 : i32, i32
  }
  func.func @transform_3(%arg0: i32) -> (i32, i32, i32) {
    %c0_i32 = arith.constant 0 : i32
    %c0_i32_0 = arith.constant 0 : i32
    %c0_i32_1 = arith.constant 0 : i32
    return %arg0, %c0_i32, %c0_i32_0 : i32, i32, i32
  }
}

</mosaic_0001>

<bundles_post_ra>
// kernel: tpu_custom_call.1
= control target key start
LH: loop header
LB: loop body
LE: loop exit
PB: predicated region body
PF: predicated region fallthrough
CT: control target
= control target key end

     0   :  { %8 = vsyncpa [#allocation3], 0  ;;  %s792_s0 = inlined_call_operand.hbm [shape: f32[2,8,128], index: 0, kind: input, shape index: {}]   ;;  %s793_s1 = inlined_call_operand.vmem [shape: f32[8,24], index: 1, kind: input, shape index: {}]   ;;  %s794_s2 = inlined_call_operand.vmem [shape: f32[8,1], index: 2, kind: input, shape index: {}]   ;;  %s795_s3 = inlined_call_operand.hbm [shape: f32[2,8,128], index: 3, kind: output, shape index: {}]  }
   0x1   :  { %9 = vsyncpa [#allocation4], 0  ;;  %s564_s12 = smov [#allocation2]   ;;  %s516_s16 = scalar_lea.hbm %s792_s0, 256 }
   0x2   :  { %s15_s13 = sshll.u32 %s564_s12, 4  ;;  %p517_p0 = scmp.ne.s32.totalorder %s792_s0, %s516_s16  ;;  %s16_s13 = int_to_ptr.vmem [resolvable:$true] %s15_s13 }
   0x3   :  { %p520_p1 = scmp.lt.u32.totalorder %s516_s16, %s792_s0 }
   0x5   :  { %p522_p2 = pnand %p520_p1, %p517_p0 }
   0x7   :  { %525 = shalt.err (!%p522_p2)
}
   0x8   :  { %s526_s21 = scalar_lea.vmem %s16_s13, 256  ;;  %p531_p4 = scmp.lt.s32.totalorder %s16_s13, %s16_s13 }
   0x9   :  { %p527_p3 = scmp.ne.s32.totalorder %s16_s13, %s526_s21  ;;  %p532_p5 = scmp.lt.s32.totalorder %s526_s21, %s526_s21 }
   0xb   :  { %p533_p6 = por %p532_p5, %p531_p4 }
   0xd   :  { %p534_p7 = pnand %p533_p6, %p527_p3 }
   0xf   :  { %537 = shalt.err (!%p534_p7)
}
  0x10   :  { %s565_s22 = smov 128   ;;  %s566_s23 = smov 8  }
  0x11   :  { %21 = dma.hbm_to_vmem [thread:$0]  %s792_s0, 256, %s16_s13, [#allocation3], %s565_s22, %s565_s22, %s566_s23  }
  0x12   :  { %560 = dma.done.wait [#allocation3], 256  }
  0x13   :  { %561 = vsyncadd [#allocation3], 4294967040  ;;  %v567_v0 = vmov 1   ;;  %v568_v1 = vmov 0   ;;  %v632_v2 = vld [vmem:[%s793_s1] sm:$0xff]  ;;  %s569_s0 = smov 1   ;;  %v29_v28 = vlaneseq }
  0x14   :  { %493 = vset.pattern.permute.xlu1 %v567_v0  ;;  %492 = vset.pattern.permute.xlu0 %v568_v1  ;;  %v636_v3 = vld [vmem:[#allocation2] sm:$0xff]  ;;  %v642_v5 = vld [vmem:[#allocation2 + $0x8] sm:$0xff]  ;;  %v570_v6 = vmov 3   ;;  %v571_v7 = vmov 2   ;;  %v572_v8 = vmov 4   ;;  %v573_v9 = vmov 5  }
  0x15   :  { %59 = vperm.xlu1 %493, %v632_v2   ;;  %49 = vperm.xlu0 %492, %v632_v2   ;;  %v32_v4 = vld [vmem:[%s794_s2] sm:$0xff]  ;;  %v574_v10 = vmov 7   ;;  %v575_v11 = vmov 6   ;;  %v576_v12 = vmov 10   ;;  %v577_v13 = vmov 8   ;;  %s589_s1 = smov 127  }
  0x16   :  { %v578_v14 = vmov 13   ;;  %v579_v15 = vmov 9   ;;  %v580_v16 = vmov 16   ;;  %v581_v17 = vmov 11   ;;  %s593_s2 = smov [#allocation5]  }
  0x17   :  { %v582_v18 = vmov 18   ;;  %v583_v19 = vmov 12   ;;  %v584_v20 = vmov 20   ;;  %v585_v21 = vmov 14   ;;  %s450_s30 = sshll.u32 %s593_s2, 4  ;;  %s451_s30 = int_to_ptr.vmem [resolvable:$true] %s450_s30 }
  0x18   :  { %v586_v22 = vmov 23   ;;  %v587_v23 = vmov 15   ;;  %v588_v24 = vmov 17   ;;  %v590_v25 = vmov 19   ;;  %s538_s4 = scalar_lea.vmem %s451_s30, 256  ;;  %p543_p9 = scmp.lt.s32.totalorder %s451_s30, %s451_s30 }
  0x19   :  { %40 = vrot.lane.b32.xlu1 %v636_v3, %s569_s0  ;;  %35 = vperm.xlu0 %492, %v32_v4   ;;  %v591_v26 = vmov 21   ;;  %v592_v27 = vmov 22   ;;  %v669_v29 = vand.u32 127, %v29_v28  ;;  %v53_v30 = vshrl.u32 %v29_v28, 7  ;;  %p539_p8 = scmp.ne.s32.totalorder %s451_s30, %s538_s4  ;;  %p544_p10 = scmp.lt.s32.totalorder %s538_s4, %s538_s4 }
  0x1a   :  { %495 = vset.pattern.permute.xlu1 %v570_v6 }
  0x1b   :  { %vm39_vm0 = vcmp.ge.s32.totalorder %v669_v29, 1  ;;  %v672_v32 = vsub.s32 0, %v53_v30  ;;  %v678_v37 = vsub.s32 1, %v53_v30  ;;  %v688_v48 = vsub.s32 2, %v53_v30  ;;  %p545_p11 = por %p544_p10, %p543_p9 }
  0x1c   :  { %v690_v51 = vsub.s32 3, %v53_v30  ;;  %v698_v61 = vsub.s32 4, %v53_v30  ;;  %vm43_vm1 = vcmp.lt.s32.totalorder %v669_v29, 127 }
  0x1d   :  { %292 = vrot.lane.b32.xlu1 %v642_v5, %s569_s0  ;;  %494 = vset.pattern.permute.xlu0 %v571_v7  ;;  %p546_p12 = pnand %p545_p11, %p539_p8 }
  0x1e   :  { %69 = vperm.xlu0 %494, %v632_v2  }
  0x21   :  { %79 = vperm.xlu1 %495, %v632_v2  }
  0x22   :  { %496 = vset.pattern.permute.xlu0 %v572_v8  ;;  %v704_v8 = vsub.s32 5, %v53_v30 }
  0x23   :  { %89 = vperm.xlu0 %496, %v632_v2  }
  0x25   :  { %497 = vset.pattern.permute.xlu1 %v573_v9 }
  0x26   :  { %99 = vperm.xlu1 %497, %v632_v2  }
  0x27   :  { %499 = vset.pattern.permute.xlu0 %v574_v10 }
  0x28   :  { %119 = vperm.xlu0 %499, %v632_v2  }
  0x2a   :  { %498 = vset.pattern.permute.xlu1 %v575_v11 }
  0x2b   :  { %109 = vperm.xlu1 %498, %v632_v2  }
  0x2c   :  { %502 = vset.pattern.permute.xlu0 %v576_v12  ;;  %v706_v12 = vsub.s32 6, %v53_v30 }
  0x2d   :  { %149 = vperm.xlu0 %502, %v632_v2  }
  0x2f   :  { %500 = vset.pattern.permute.xlu1 %v577_v13 }
  0x30   :  { %129 = vperm.xlu1 %500, %v632_v2  }
  0x31   :  { %505 = vset.pattern.permute.xlu0 %v578_v14 }
  0x32   :  { %179 = vperm.xlu0 %505, %v632_v2  }
  0x34   :  { %501 = vset.pattern.permute.xlu1 %v579_v15 }
  0x35   :  { %139 = vperm.xlu1 %501, %v632_v2  }
  0x36   :  { %508 = vset.pattern.permute.xlu0 %v580_v16 }
  0x37   :  { %209 = vperm.xlu0 %508, %v632_v2  }
  0x39   :  { %503 = vset.pattern.permute.xlu1 %v581_v17 }
  0x3a   :  { %159 = vperm.xlu1 %503, %v632_v2  }
  0x3b   :  { %510 = vset.pattern.permute.xlu0 %v582_v18 }
  0x3c   :  { %229 = vperm.xlu0 %510, %v632_v2  }
  0x3e   :  { %504 = vset.pattern.permute.xlu1 %v583_v19 }
  0x3f   :  { %169 = vperm.xlu1 %504, %v632_v2  }
  0x40   :  { %512 = vset.pattern.permute.xlu0 %v584_v20 }
  0x41   :  { %249 = vperm.xlu0 %512, %v632_v2  }
  0x43   :  { %506 = vset.pattern.permute.xlu1 %v585_v21 }
  0x44   :  { %189 = vperm.xlu1 %506, %v632_v2  }
  0x45   :  { %515 = vset.pattern.permute.xlu0 %v586_v22 }
  0x46   :  { %279 = vperm.xlu0 %515, %v632_v2  }
  0x48   :  { %507 = vset.pattern.permute.xlu1 %v587_v23  ;;  %v716_v23 = vsub.s32 7, %v53_v30 }
  0x49   :  { %199 = vperm.xlu1 %507, %v632_v2  }
  0x4d   :  { %509 = vset.pattern.permute.xlu1 %v588_v24 }
  0x4e   :  { %219 = vperm.xlu1 %509, %v632_v2  }
  0x52   :  { %44 = vrot.lane.b32.xlu1 %v636_v3, %s589_s1 }
  0x53   :  { %511 = vset.pattern.permute.xlu1 %v590_v25 }
  0x56   :  { %295 = vrot.lane.b32.xlu1 %v642_v5, %s589_s1 }
  0x5a   :  { %239 = vperm.xlu1 %511, %v632_v2  }
  0x5e   :  { %513 = vset.pattern.permute.xlu1 %v591_v26 }
  0x5f   :  { %259 = vperm.xlu1 %513, %v632_v2  }
  0x63   :  { %514 = vset.pattern.permute.xlu1 %v592_v27 }
  0x64   :  { %269 = vperm.xlu1 %514, %v632_v2  }
  0x94   :  { %v60_v31 = vpop.permute.xlu1 %59  ;;  %v50_v34 = vpop.permute.xlu0 %49 }
  0x98   :  { %v41_v33 = vpop.permute.xlu1 %40  ;;  %v36_v42 = vpop.permute.xlu0 %35 }
  0x99   :  { %v674_v35 = vsel %vm39_vm0, %v41_v33, 0.0 }
  0x9a   :  { %v55_v36 = vrot.slane %v674_v35, %v672_v32  ;;  %v65_v43 = vrot.slane %v674_v35, %v678_v37  ;;  %v75_v57 = vrot.slane %v674_v35, %v688_v48  ;;  %v85_v60 = vrot.slane %v674_v35, %v690_v51 }
  0x9b   :  { %v95_v7 = vrot.slane %v674_v35, %v698_v61  ;;  %v105_v16 = vrot.slane %v674_v35, %v704_v8  ;;  %v115_v20 = vrot.slane %v674_v35, %v706_v12 }
  0x9c   :  { %v293_v38 = vpop.permute.xlu1 %292  ;;  %v56_v40 = vmul.f32 %v55_v36, %v50_v34  ;;  %v66_v50 = vmul.f32 %v65_v43, %v60_v31  ;;  %v125_v36 = vrot.slane %v674_v35, %v716_v23  ;;  %v355_v35 = vrot.slane %v642_v5, %v678_v37 }
  0x9d   :  { %v680_v39 = vsel %vm39_vm0, %v293_v38, 0.0  ;;  %v70_v54 = vpop.permute.xlu0 %69 }
  0x9e   :  { %v301_v41 = vrot.slane %v680_v39, %v672_v32  ;;  %v307_v46 = vrot.slane %v680_v39, %v678_v37  ;;  %v57_v47 = vadd.f32 %v56_v40, %v36_v42  ;;  %v313_v53 = vrot.slane %v680_v39, %v688_v48 }
  0x9f   :  { %v76_v59 = vmul.f32 %v75_v57, %v70_v54  ;;  %v319_v63 = vrot.slane %v680_v39, %v690_v51  ;;  %v325_v14 = vrot.slane %v680_v39, %v698_v61  ;;  %v331_v22 = vrot.slane %v680_v39, %v704_v8 }
  0xa0   :  { %v302_v44 = vmul.f32 %v301_v41, %v50_v34  ;;  %v80_v45 = vpop.permute.xlu1 %79  ;;  %v308_v52 = vmul.f32 %v307_v46, %v60_v31  ;;  %v67_v56 = vadd.f32 %v66_v50, %v57_v47  ;;  %v314_v62 = vmul.f32 %v313_v53, %v70_v54 }
  0xa1   :  { %v86_v1 = vmul.f32 %v85_v60, %v80_v45  ;;  %v320_v9 = vmul.f32 %v319_v63, %v80_v45  ;;  %v337_v27 = vrot.slane %v680_v39, %v706_v12  ;;  %v135_v40 = vrot.slane %v636_v3, %v672_v32 }
  0xa2   :  { %v303_v49 = vadd.f32 %v302_v44, %v36_v42  ;;  %v77_v0 = vadd.f32 %v76_v59, %v67_v56  ;;  %v90_v6 = vpop.permute.xlu0 %89  ;;  %v145_v42 = vrot.slane %v636_v3, %v678_v37  ;;  %v343_v43 = vrot.slane %v680_v39, %v716_v23 }
  0xa3   :  { %v96_v11 = vmul.f32 %v95_v7, %v90_v6  ;;  %v326_v17 = vmul.f32 %v325_v14, %v90_v6  ;;  %v349_v45 = vrot.slane %v642_v5, %v672_v32  ;;  %v367_v6 = vrot.slane %v642_v5, %v690_v51 }
  0xa4   :  { %v309_v58 = vadd.f32 %v308_v52, %v303_v49  ;;  %v87_v10 = vadd.f32 %v86_v1, %v77_v0  ;;  %v155_v52 = vrot.slane %v636_v3, %v688_v48  ;;  %v175_v1 = vrot.slane %v636_v3, %v698_v61 }
  0xa5   :  { %v100_v55 = vpop.permute.xlu1 %99 }
  0xa6   :  { %v315_v4 = vadd.f32 %v314_v62, %v309_v58  ;;  %v97_v18 = vadd.f32 %v96_v11, %v87_v10  ;;  %v106_v19 = vmul.f32 %v105_v16, %v100_v55  ;;  %v332_v26 = vmul.f32 %v331_v22, %v100_v55 }
  0xa7   :  { %v120_v33 = vpop.permute.xlu0 %119  ;;  %v361_v58 = vrot.slane %v642_v5, %v688_v48  ;;  %v165_v62 = vrot.slane %v636_v3, %v690_v51  ;;  %v373_v10 = vrot.slane %v642_v5, %v698_v61 }
  0xa8   :  { %v321_v13 = vadd.f32 %v320_v9, %v315_v4  ;;  %v107_v28 = vadd.f32 %v106_v19, %v97_v18  ;;  %v126_v30 = vmul.f32 %v125_v36, %v120_v33  ;;  %v344_v49 = vmul.f32 %v343_v43, %v120_v33 }
  0xa9   :  { %v385_v33 = vrot.slane %v642_v5, %v706_v12 }
  0xaa   :  { %v110_v2 = vpop.permute.xlu1 %109  ;;  %v327_v21 = vadd.f32 %v326_v17, %v321_v13  ;;  %v185_v13 = vrot.slane %v636_v3, %v704_v8 }
  0xab   :  { %v116_v24 = vmul.f32 %v115_v20, %v110_v2  ;;  %v338_v34 = vmul.f32 %v337_v27, %v110_v2  ;;  %v379_v20 = vrot.slane %v642_v5, %v704_v8  ;;  %v205_v27 = vrot.slane %v636_v3, %v716_v23 }
  0xac   :  { %v333_v31 = vadd.f32 %v332_v26, %v327_v21  ;;  %v150_v56 = vpop.permute.xlu0 %149 }
  0xad   :  { %v117_v38 = vadd.f32 %v116_v24, %v107_v28  ;;  %v156_v60 = vmul.f32 %v155_v52, %v150_v56  ;;  %v362_v4 = vmul.f32 %v361_v58, %v150_v56  ;;  %v195_v24 = vrot.slane %v636_v3, %v706_v12 }
  0xae   :  { %v339_v44 = vadd.f32 %v338_v34, %v333_v31 }
  0xaf   :  { %v130_v15 = vpop.permute.xlu1 %129  ;;  %v127_v46 = vadd.f32 %v126_v30, %v117_v38  ;;  %v391_v38 = vrot.slane %v642_v5, %v716_v23 }
  0xb0   :  { %v136_v47 = vmul.f32 %v135_v40, %v130_v15  ;;  %v345_v54 = vadd.f32 %v344_v49, %v339_v44  ;;  %v350_v55 = vmul.f32 %v349_v45, %v130_v15 }
  0xb1   :  { %v180_v17 = vpop.permute.xlu0 %179 }
  0xb2   :  { %v137_v57 = vadd.f32 %v136_v47, %v127_v46  ;;  %v351_v63 = vadd.f32 %v350_v55, %v345_v54  ;;  %v186_v22 = vmul.f32 %v185_v13, %v180_v17  ;;  %v380_v31 = vmul.f32 %v379_v20, %v180_v17 }
  0xb4   :  { %v140_v25 = vpop.permute.xlu1 %139 }
  0xb5   :  { %v146_v50 = vmul.f32 %v145_v42, %v140_v25  ;;  %v356_v39 = vmul.f32 %v355_v35, %v140_v25 }
  0xb6   :  { %v210_v40 = vpop.permute.xlu0 %209 }
  0xb7   :  { %v147_v59 = vadd.f32 %v146_v50, %v137_v57  ;;  %v357_v2 = vadd.f32 %v356_v39, %v351_v63 }
  0xb9   :  { %v160_v41 = vpop.permute.xlu1 %159  ;;  %v157_v7 = vadd.f32 %v156_v60, %v147_v59  ;;  %v363_v15 = vadd.f32 %v362_v4, %v357_v2 }
  0xba   :  { %v166_v9 = vmul.f32 %v165_v62, %v160_v41  ;;  %v368_v16 = vmul.f32 %v367_v6, %v160_v41 }
  0xbb   :  { %v230_v54 = vpop.permute.xlu0 %229 }
  0xbc   :  { %v167_v18 = vadd.f32 %v166_v9, %v157_v7  ;;  %v369_v25 = vadd.f32 %v368_v16, %v363_v15 }
  0xbe   :  { %v170_v53 = vpop.permute.xlu1 %169 }
  0xbf   :  { %v176_v11 = vmul.f32 %v175_v1, %v170_v53  ;;  %v374_v19 = vmul.f32 %v373_v10, %v170_v53 }
  0xc1   :  { %v177_v21 = vadd.f32 %v176_v11, %v167_v18  ;;  %v375_v28 = vadd.f32 %v374_v19, %v369_v25 }
  0xc3   :  { %v190_v0 = vpop.permute.xlu1 %189  ;;  %v187_v34 = vadd.f32 %v186_v22, %v177_v21  ;;  %v381_v43 = vadd.f32 %v380_v31, %v375_v28 }
  0xc4   :  { %v196_v36 = vmul.f32 %v195_v24, %v190_v0  ;;  %v386_v3 = vmul.f32 %v385_v33, %v190_v0 }
  0xc6   :  { %v197_v45 = vadd.f32 %v196_v36, %v187_v34  ;;  %v387_v53 = vadd.f32 %v386_v3, %v381_v43 }
  0xc8   :  { %v200_v14 = vpop.permute.xlu1 %199 }
  0xc9   :  { %v206_v30 = vmul.f32 %v205_v27, %v200_v14  ;;  %v392_v47 = vmul.f32 %v391_v38, %v200_v14 }
  0xcb   :  { %v207_v50 = vadd.f32 %v206_v30, %v197_v45  ;;  %v393_v59 = vadd.f32 %v392_v47, %v387_v53 }
  0xcd   :  { %v220_v26 = vpop.permute.xlu1 %219 }
  0xd1   :  { %v45_v41 = vpop.permute.xlu1 %44 }
  0xd2   :  { %v46_v42 = vsel %vm43_vm1, %v45_v41, 0.0 }
  0xd3   :  { %v215_v44 = vrot.slane %v46_v42, %v672_v32  ;;  %v225_v46 = vrot.slane %v46_v42, %v678_v37  ;;  %v235_v52 = vrot.slane %v46_v42, %v688_v48  ;;  %v245_v39 = vrot.slane %v46_v42, %v690_v51 }
  0xd4   :  { %v255_v2 = vrot.slane %v46_v42, %v698_v61  ;;  %v285_v22 = vrot.slane %v46_v42, %v716_v23  ;;  %v275_v24 = vrot.slane %v46_v42, %v706_v12 }
  0xd5   :  { %v296_v49 = vpop.permute.xlu1 %295  ;;  %v216_v35 = vmul.f32 %v215_v44, %v210_v40  ;;  %v226_v57 = vmul.f32 %v225_v46, %v220_v26  ;;  %v236_v29 = vmul.f32 %v235_v52, %v230_v54 }
  0xd6   :  { %v297_v5 = vsel %vm43_vm1, %v296_v49, 0.0 }
  0xd7   :  { %v397_v55 = vrot.slane %v297_v5, %v672_v32  ;;  %v403_v56 = vrot.slane %v297_v5, %v678_v37  ;;  %v217_v58 = vadd.f32 %v216_v35, %v207_v50  ;;  %v409_v60 = vrot.slane %v297_v5, %v688_v48  ;;  %v250_v37 = vpop.permute.xlu0 %249 }
  0xd8   :  { %v415_v6 = vrot.slane %v297_v5, %v690_v51  ;;  %v421_v11 = vrot.slane %v297_v5, %v698_v61  ;;  %v265_v48 = vrot.slane %v46_v42, %v704_v8  ;;  %v256_v15 = vmul.f32 %v255_v2, %v250_v37 }
  0xd9   :  { %v240_v62 = vpop.permute.xlu1 %239  ;;  %v398_v63 = vmul.f32 %v397_v55, %v210_v40  ;;  %v227_v0 = vadd.f32 %v226_v57, %v217_v58  ;;  %v404_v4 = vmul.f32 %v403_v56, %v220_v26  ;;  %v410_v10 = vmul.f32 %v409_v60, %v230_v54 }
  0xda   :  { %v246_v1 = vmul.f32 %v245_v39, %v240_v62  ;;  %v416_v17 = vmul.f32 %v415_v6, %v240_v62  ;;  %v427_v21 = vrot.slane %v297_v5, %v704_v8  ;;  %v422_v51 = vmul.f32 %v421_v11, %v250_v37 }
  0xdb   :  { %v399_v32 = vadd.f32 %v398_v63, %v393_v59  ;;  %v237_v7 = vadd.f32 %v236_v29, %v227_v0  ;;  %v433_v25 = vrot.slane %v297_v5, %v706_v12  ;;  %v280_v61 = vpop.permute.xlu0 %279  ;;  %v439_v28 = vrot.slane %v297_v5, %v716_v23 }
  0xdc   :  { %v286_v40 = vmul.f32 %v285_v22, %v280_v61 }
  0xdd   :  { %v405_v9 = vadd.f32 %v404_v4, %v399_v32  ;;  %v247_v13 = vadd.f32 %v246_v1, %v237_v7  ;;  %v440_v30 = vmul.f32 %v439_v28, %v280_v61 }
  0xde   :  { %v260_v14 = vpop.permute.xlu1 %259 }
  0xdf   :  { %v411_v16 = vadd.f32 %v410_v10, %v405_v9  ;;  %v257_v18 = vadd.f32 %v256_v15, %v247_v13  ;;  %v266_v19 = vmul.f32 %v265_v48, %v260_v14  ;;  %v428_v27 = vmul.f32 %v427_v21, %v260_v14 }
  0xe1   :  { %v417_v20 = vadd.f32 %v416_v17, %v411_v16  ;;  %v267_v33 = vadd.f32 %v266_v19, %v257_v18 }
  0xe3   :  { %v423_v26 = vadd.f32 %v422_v51, %v417_v20  ;;  %v270_v31 = vpop.permute.xlu1 %269 }
  0xe4   :  { %v276_v34 = vmul.f32 %v275_v24, %v270_v31  ;;  %v434_v36 = vmul.f32 %v433_v25, %v270_v31 }
  0xe5   :  { %v429_v38 = vadd.f32 %v428_v27, %v423_v26 }
  0xe6   :  { %v277_v41 = vadd.f32 %v276_v34, %v267_v33 }
  0xe7   :  { %v435_v8 = vadd.f32 %v434_v36, %v429_v38 }
  0xe8   :  { %v287_v43 = vadd.f32 %v286_v40, %v277_v41 }
  0xe9   :  { %v441_v42 = vadd.f32 %v440_v30, %v435_v8 }
  0xea   :  { %v288_v3 = vmax.f32 %v287_v43, 0.0 }
  0xeb   :  { %v442_v12 = vmax.f32 %v441_v42, 0.0 }
  0xec   :  { %289 = vst [vmem:[#allocation5] sm:$0xff] %v288_v3 }
  0xed   :  { %444 = vst [vmem:[#allocation5 + $0x8] sm:$0xff] %v442_v12 }
  0xee   :  { %549 = shalt.err (!%p546_p12)
}
  0xef   :  { %s550_s7 = scalar_lea.hbm %s795_s3, 256 }
  0xf0   :  { %p551_p13 = scmp.ne.s32.totalorder %s795_s3, %s550_s7  ;;  %p554_p0 = scmp.lt.u32.totalorder %s550_s7, %s795_s3 }
  0xf2   :  { %p556_p1 = pnand %p554_p0, %p551_p13 }
  0xf4   :  { %559 = shalt.err (!%p556_p1)
}
  0xf5   :  { %456 = dma.vmem_to_hbm [thread:$0]  %s451_s30, 256, %s795_s3, [#allocation4], %s565_s22, %s565_s22, %s566_s23  }
  0xf6   :  { %562 = dma.done.wait [#allocation4], 256  }
  0xf7   :  { %563 = vsyncadd [#allocation4], 4294967040 }
  0xf8   :  { %460 = vsyncpa [#allocation3], 1 }
  0xf9   :  { %461 = vsyncpa [#allocation4], 1 }

</bundles_post_ra>
